<compile_context>
chip_gen: v7x
topology: tpu7x:2x2x1
jax: 0.10.0
libtpu: 0.0.40
codegen_flags: <defaults>
</compile_context>

<pallas_src>
import jax
import jax.numpy as jnp
from jax.experimental import pallas as pl
from jax.experimental.pallas import tpu as pltpu

IN_FEATURES = 28 * 28   # 784
OUT_FEATURES = 10


def _round_up(n, m):
    return ((n + m - 1) // m) * m


def _linear_kernel(x_ref, w_ref, b_ref, o_ref):
    # x_ref: (TB, 784), w_ref: (784, 10), b_ref: (1, 10), o_ref: (TB, 10)
    acc = jnp.dot(x_ref[...], w_ref[...], preferred_element_type=jnp.float32)
    o_ref[...] = (acc + b_ref[...]).astype(o_ref.dtype)


def prepare_params(weight, bias):
    """One-time param prep (hoisted out of the hot path).

    weight: (10, 784) (PyTorch nn.Linear convention), bias: (10,)
    returns (w_t, b2) = ((784, 10), (1, 10))
    """
    return weight.T, bias.reshape(1, OUT_FEATURES)


def mnist_linear_regression(x, w_t, b2, *, block_b=2048, activation_buffers=2):
    """Forward pass of MnistLinearRegression.

    x:   (B, 1, 28, 28) float32 (or bfloat16 for the reduced-precision path)
    w_t: (784, 10)  -- from prepare_params
    b2:  (1, 10)    -- from prepare_params
    returns (B, 10) in x.dtype
    """
    B = x.shape[0]
    x_flat = x.reshape(B, -1)                       # (B, 784) -- glue only

    # Batch tile: multiple of 8 (sublane), capped so the grid has >= 2 steps
    # (lets the "parallel" axis span both v7x TensorCores), capped at block_b.
    tb = min(block_b, _round_up(pl.cdiv(B, 2), 8))
    tb = max(8, _round_up(tb, 8))
    grid = (pl.cdiv(B, tb),)                        # partial last block is OK

    itemsize = jnp.dtype(x_flat.dtype).itemsize
    cost = pl.CostEstimate(
        flops=2 * B * IN_FEATURES * OUT_FEATURES,
        bytes_accessed=(B * IN_FEATURES * itemsize
                        + IN_FEATURES * OUT_FEATURES * jnp.dtype(w_t.dtype).itemsize
                        + B * OUT_FEATURES * itemsize),
        transcendentals=0,
    )

    # Optional deeper pipelining of the activation stream (sweep on v7x).
    x_spec_kwargs = {}
    if activation_buffers != 2:
        x_spec_kwargs["pipeline_mode"] = pl.Buffered(activation_buffers)

    out = pl.pallas_call(
        _linear_kernel,
        out_shape=jax.ShapeDtypeStruct((B, OUT_FEATURES), x.dtype),
        grid=grid,
        in_specs=[
            # Activations: one (TB, 784) tile per grid step -> pipelined DMA.
            pl.BlockSpec((tb, IN_FEATURES), lambda i: (i, 0), **x_spec_kwargs),
            # Weight / bias: same block every step -> stay VMEM-resident.
            pl.BlockSpec((IN_FEATURES, OUT_FEATURES), lambda i: (0, 0)),
            pl.BlockSpec((1, OUT_FEATURES), lambda i: (0, 0)),
        ],
        out_specs=pl.BlockSpec((tb, OUT_FEATURES), lambda i: (i, 0)),
        compiler_params=pltpu.CompilerParams(
            dimension_semantics=("parallel",),
            vmem_limit_bytes=32 * 1024 * 1024,
        ),
        cost_estimate=cost,
    )(x_flat, w_t, b2)

    return out


def init_params(key):
    """Deterministic init matching nn.Linear(784, 10) default (U(-k, k), k=1/sqrt(784))."""
    k_w, k_b = jax.random.split(key)
    bound = 1.0 / (IN_FEATURES ** 0.5)
    weight = jax.random.uniform(
        k_w, (OUT_FEATURES, IN_FEATURES), jnp.float32, minval=-bound, maxval=bound)
    bias = jax.random.uniform(
        k_b, (OUT_FEATURES,), jnp.float32, minval=-bound, maxval=bound)
    return weight, bias


if __name__ == "__main__":
    key = jax.random.PRNGKey(0)
    k_x, k_params = jax.random.split(key)

    weight, bias = init_params(k_params)
    w_t, b2 = prepare_params(weight, bias)   # hoisted once, not per-call

    # Small shape consistent with the module: B=2, NCHW MNIST input.
    B = 2
    x = jax.random.normal(k_x, (B, 1, 28, 28), jnp.float32)
    out = jax.block_until_ready(mnist_linear_regression(x, w_t, b2))
    ref = x.reshape(B, -1) @ weight.T + bias
    assert out.shape == (B, OUT_FEATURES)
    assert jnp.allclose(out, ref, atol=1e-4, rtol=1e-4)

    # Also exercise grid > 1 with a partial (masked) last block and no padding.
    B2 = 20
    x2 = jax.random.normal(jax.random.PRNGKey(1), (B2, 1, 28, 28), jnp.float32)
    out2 = jax.block_until_ready(mnist_linear_regression(x2, w_t, b2))
    ref2 = x2.reshape(B2, -1) @ weight.T + bias
    assert out2.shape == (B2, OUT_FEATURES)
    assert jnp.allclose(out2, ref2, atol=1e-4, rtol=1e-4)

    print("KERNEL_OK")
</pallas_src>

<mosaic_0001>
module attributes {stable_mosaic.version = 11 : i64} {
  func.func @_linear_kernel(%arg0: i32, %arg1: memref<8x784xf32, #tpu.memory_space<vmem>>, %arg2: memref<784x10xf32, #tpu.memory_space<vmem>>, %arg3: memref<1x10xf32, #tpu.memory_space<vmem>>, %arg4: memref<8x10xf32, #tpu.memory_space<vmem>>) attributes {dimension_semantics = [#tpu.dimension_semantics<parallel>], iteration_bounds = array<i64: 1>, scalar_prefetch = 0 : i64, scratch_operands = 0 : i64, tpu.core_type = #tpu.core_type<tc>, window_params = [{transform_indices = @transform_0, window_bounds = array<i64: 8, 784>}, {pipeline_mode = #tpu.pipeline_mode<synchronous>, transform_indices = @transform_1, window_bounds = array<i64: 784, 10>}, {pipeline_mode = #tpu.pipeline_mode<synchronous>, transform_indices = @transform_2, window_bounds = array<i64: 1, 10>}, {transform_indices = @transform_3, window_bounds = array<i64: 8, 10>}]} {
    %c0 = arith.constant 0 : index
    %c0_0 = arith.constant 0 : index
    %0 = vector.load %arg1[%c0, %c0_0] : memref<8x784xf32, #tpu.memory_space<vmem>>, vector<8x784xf32>
    %c0_1 = arith.constant 0 : index
    %c0_2 = arith.constant 0 : index
    %1 = vector.load %arg2[%c0_1, %c0_2] : memref<784x10xf32, #tpu.memory_space<vmem>>, vector<784x10xf32>
    %cst = arith.constant dense<0.000000e+00> : vector<8x10xf32>
    %2 = tpu.matmul %0, %1, %cst {dimension_numbers = #tpu.dot_dimension_numbers<[1], [0], [0], [1], [0, 0, 1, 1], [], []>} : vector<8x784xf32>, vector<784x10xf32>, vector<8x10xf32> -> vector<8x10xf32>
    %c0_3 = arith.constant 0 : index
    %c0_4 = arith.constant 0 : index
    %3 = vector.load %arg3[%c0_3, %c0_4] : memref<1x10xf32, #tpu.memory_space<vmem>>, vector<1x10xf32>
    %4 = vector.broadcast %3 : vector<1x10xf32> to vector<8x10xf32>
    %5 = arith.addf %2, %4 : vector<8x10xf32>
    %c0_5 = arith.constant 0 : index
    %c0_6 = arith.constant 0 : index
    %6 = vector.load %arg4[%c0_5, %c0_6] : memref<8x10xf32, #tpu.memory_space<vmem>>, vector<8x10xf32>
    tpu.vector_store %arg4[%c0_5, %c0_6], %5 {strides = array<i32>} : memref<8x10xf32, #tpu.memory_space<vmem>>, vector<8x10xf32>,
    return
  }
  func.func @transform_0(%arg0: i32) -> (i32, i32) {
    %c0_i32 = arith.constant 0 : i32
    %c0_i32_0 = arith.constant 0 : i32
    return %arg0, %c0_i32 : i32, i32
  }
  func.func @transform_1(%arg0: i32) -> (i32, i32) {
    %c0_i32 = arith.constant 0 : i32
    %c0_i32_0 = arith.constant 0 : i32
    %c0_i32_1 = arith.constant 0 : i32
    return %c0_i32, %c0_i32_0 : i32, i32
  }
  func.func @transform_2(%arg0: i32) -> (i32, i32) {
    %c0_i32 = arith.constant 0 : i32
    %c0_i32_0 = arith.constant 0 : i32
    %c0_i32_1 = arith.constant 0 : i32
    return %c0_i32, %c0_i32_0 : i32, i32
  }
  func.func @transform_3(%arg0: i32) -> (i32, i32) {
    %c0_i32 = arith.constant 0 : i32
    %c0_i32_0 = arith.constant 0 : i32
    return %arg0, %c0_i32 : i32, i32
  }
}

</mosaic_0001>

<bundles_post_ra>
// kernel: tpu_custom_call.1
= control target key start
LH: loop header
LB: loop body
LE: loop exit
PB: predicated region body
PF: predicated region fallthrough
CT: control target
= control target key end

     0   :  { %8 = vsyncpa [#allocation3], 0  ;;  %v773_v51 = vmov 1983009808   ;;  %v143_v53 = vlaneseq  ;;  %vm775_vm0 = vmmov 0   ;;  %vm213_vm1 = vcmask 130048   ;;  %s1143_s0 = inlined_call_operand.vmem [shape: f32[2,784], index: 0, kind: input, shape index: {}]   ;;  %s1144_s1 = inlined_call_operand.vmem [shape: f32[784,10], index: 1, kind: input, shape index: {}]   ;;  %s1145_s2 = inlined_call_operand.vmem [shape: f32[1,10], index: 2, kind: input, shape index: {}]   ;;  %s1146_s3 = inlined_call_operand.hbm [shape: f32[2,10], index: 3, kind: output, shape index: {}]  }
   0x1   :  { %v39_v0 = vld [vmem:[%s1144_s1 + $0x80] sm:$0xff]  ;;  %v40_v1 = vld [vmem:[%s1144_s1 + $0x88] sm:$0xff]  ;;  %v41_v12 = vld [vmem:[%s1144_s1 + $0x90] sm:$0xff]  ;;  %v141_v52 = vunpack.c.l.s4 %v773_v51  ;;  %vm496_vm2 = vcmask 80896  }
   0x2   :  { %v631_v2 = vpack.c.bf16 %v40_v1, %v39_v0  ;;  %v23_v3 = vld [vmem:[%s1144_s1] sm:$0xff]  ;;  %v24_v4 = vld [vmem:[%s1144_s1 + $0x8] sm:$0xff]  ;;  %v42_v13 = vld [vmem:[%s1144_s1 + $0x98] sm:$0xff] }
   0x3   :  { %v71_v5 = vld [vmem:[%s1144_s1 + $0x180] sm:$0xff]  ;;  %v633_v6 = vpack.c.bf16 %v24_v4, %v23_v3  ;;  %v72_v7 = vld [vmem:[%s1144_s1 + $0x188] sm:$0xff]  ;;  %v25_v14 = vld [vmem:[%s1144_s1 + $0x10] sm:$0xff]  ;;  %v635_v15 = vpack.c.bf16 %v42_v13, %v41_v12  ;;  %v144_v3 = vshrl.u32 %v143_v53, 7 }
   0x4   :  { %v55_v8 = vld [vmem:[%s1144_s1 + $0x100] sm:$0xff]  ;;  %v56_v9 = vld [vmem:[%s1144_s1 + $0x108] sm:$0xff]  ;;  %632 = vmatprep.subr.bf16.mxu0 %v631_v2  ;;  %v663_v10 = vpack.c.bf16 %v72_v7, %v71_v5  ;;  %v26_v16 = vld [vmem:[%s1144_s1 + $0x18] sm:$0xff]  ;;  %v142_v2 = vunpack.c.0.s8 %v141_v52 }
   0x5   :  { %v665_v11 = vpack.c.bf16 %v56_v9, %v55_v8  ;;  %634 = vmatpush3.bf16.msra.mxu0 %v633_v6  ;;  %v73_v17 = vld [vmem:[%s1144_s1 + $0x190] sm:$0xff]  ;;  %v74_v18 = vld [vmem:[%s1144_s1 + $0x198] sm:$0xff]  ;;  %v637_v19 = vpack.c.bf16 %v26_v16, %v25_v14  ;;  %v43_v23 = vld [vmem:[%s1144_s1 + $0xa0] sm:$0xff] }
   0x6   :  { %664 = vmatprep.subr.bf16.mxu1 %v663_v10  ;;  %v667_v20 = vpack.c.bf16 %v74_v18, %v73_v17  ;;  %v57_v21 = vld [vmem:[%s1144_s1 + $0x110] sm:$0xff]  ;;  %v58_v22 = vld [vmem:[%s1144_s1 + $0x118] sm:$0xff]  ;;  %636 = vmatprep.subr.bf16.mxu0 %v635_v15  ;;  %v44_v25 = vld [vmem:[%s1144_s1 + $0xa8] sm:$0xff] }
   0x7   :  { %666 = vmatpush3.bf16.msra.mxu1 %v665_v11  ;;  %v669_v24 = vpack.c.bf16 %v58_v22, %v57_v21  ;;  %v27_v26 = vld [vmem:[%s1144_s1 + $0x20] sm:$0xff]  ;;  %v28_v27 = vld [vmem:[%s1144_s1 + $0x28] sm:$0xff]  ;;  %v639_v28 = vpack.c.bf16 %v44_v25, %v43_v23  ;;  %v45_v35 = vld [vmem:[%s1144_s1 + $0xb0] sm:$0xff] }
   0x8   :  { %668 = vmatprep.subr.bf16.mxu1 %v667_v20  ;;  %v75_v29 = vld [vmem:[%s1144_s1 + $0x1a0] sm:$0xff]  ;;  %v76_v30 = vld [vmem:[%s1144_s1 + $0x1a8] sm:$0xff]  ;;  %v641_v32 = vpack.c.bf16 %v28_v27, %v27_v26  ;;  %v46_v36 = vld [vmem:[%s1144_s1 + $0xb8] sm:$0xff]  ;;  %v968_v20 = vsub.s32 %v142_v2, %v144_v3 }
   0x9   :  { %v59_v31 = vld [vmem:[%s1144_s1 + $0x120] sm:$0xff]  ;;  %638 = vmatpush3.bf16.msra.mxu0 %v637_v19  ;;  %v671_v33 = vpack.c.bf16 %v76_v30, %v75_v29  ;;  %v60_v34 = vld [vmem:[%s1144_s1 + $0x128] sm:$0xff]  ;;  %v643_v37 = vpack.c.bf16 %v46_v36, %v45_v35  ;;  %v29_v38 = vld [vmem:[%s1144_s1 + $0x30] sm:$0xff] }
   0xa   :  { %640 = vmatprep.subr.bf16.mxu0 %v639_v28  ;;  %v30_v39 = vld [vmem:[%s1144_s1 + $0x38] sm:$0xff]  ;;  %v77_v40 = vld [vmem:[%s1144_s1 + $0x1b0] sm:$0xff]  ;;  %v673_v41 = vpack.c.bf16 %v60_v34, %v59_v31  ;;  %v47_v46 = vld [vmem:[%s1144_s1 + $0xc0] sm:$0xff] }
   0xb   :  { %670 = vmatpush3.bf16.msra.mxu1 %v669_v24  ;;  %v78_v42 = vld [vmem:[%s1144_s1 + $0x1b8] sm:$0xff]  ;;  %v61_v43 = vld [vmem:[%s1144_s1 + $0x130] sm:$0xff]  ;;  %v48_v47 = vld [vmem:[%s1144_s1 + $0xc8] sm:$0xff]  ;;  %v645_v48 = vpack.c.bf16 %v30_v39, %v29_v38 }
   0xc   :  { %672 = vmatprep.subr.bf16.mxu1 %v671_v33  ;;  %v675_v44 = vpack.c.bf16 %v78_v42, %v77_v40  ;;  %v62_v45 = vld [vmem:[%s1144_s1 + $0x138] sm:$0xff]  ;;  %v79_v49 = vld [vmem:[%s1144_s1 + $0x1c0] sm:$0xff]  ;;  %v80_v50 = vld [vmem:[%s1144_s1 + $0x1c8] sm:$0xff]  ;;  %v647_v54 = vpack.c.bf16 %v48_v47, %v47_v46 }
   0xd   :  { %642 = vmatpush3.bf16.msra.mxu0 %v641_v32  ;;  %v31_v55 = vld [vmem:[%s1144_s1 + $0x40] sm:$0xff]  ;;  %v32_v56 = vld [vmem:[%s1144_s1 + $0x48] sm:$0xff]  ;;  %v677_v57 = vpack.c.bf16 %v62_v45, %v61_v43  ;;  %v49_v58 = vld [vmem:[%s1144_s1 + $0xd0] sm:$0xff]  ;;  %v679_v60 = vpack.c.bf16 %v80_v50, %v79_v49 }
   0xe   :  { %644 = vmatprep.subr.bf16.mxu0 %v643_v37  ;;  %v50_v59 = vld [vmem:[%s1144_s1 + $0xd8] sm:$0xff]  ;;  %v63_v61 = vld [vmem:[%s1144_s1 + $0x140] sm:$0xff]  ;;  %v64_v62 = vld [vmem:[%s1144_s1 + $0x148] sm:$0xff]  ;;  %v649_v63 = vpack.c.bf16 %v32_v56, %v31_v55 }
   0xf   :  { %674 = vmatpush3.bf16.msra.mxu1 %v673_v41  ;;  %v81_v0 = vld [vmem:[%s1144_s1 + $0x1d0] sm:$0xff]  ;;  %v82_v1 = vld [vmem:[%s1144_s1 + $0x1d8] sm:$0xff]  ;;  %v651_v4 = vpack.c.bf16 %v50_v59, %v49_v58  ;;  %v681_v8 = vpack.c.bf16 %v64_v62, %v63_v61  ;;  %v51_v10 = vld [vmem:[%s1144_s1 + $0xe0] sm:$0xff] }
  0x10   :  { %676 = vmatprep.subr.bf16.mxu1 %v675_v44  ;;  %v33_v5 = vld [vmem:[%s1144_s1 + $0x50] sm:$0xff]  ;;  %v34_v6 = vld [vmem:[%s1144_s1 + $0x58] sm:$0xff]  ;;  %v52_v11 = vld [vmem:[%s1144_s1 + $0xe8] sm:$0xff]  ;;  %v683_v12 = vpack.c.bf16 %v82_v1, %v81_v0  ;;  %v774_v1 = vmov 0.0|0.0  }
  0x11   :  { %646 = vmatpush3.bf16.msra.mxu0 %v645_v48  ;;  %v65_v7 = vld [vmem:[%s1144_s1 + $0x150] sm:$0xff]  ;;  %v66_v9 = vld [vmem:[%s1144_s1 + $0x158] sm:$0xff]  ;;  %v35_v13 = vld [vmem:[%s1144_s1 + $0x60] sm:$0xff]  ;;  %v653_v16 = vpack.c.bf16 %v34_v6, %v33_v5  ;;  %v655_v21 = vpack.c.bf16 %v52_v11, %v51_v10 }
  0x12   :  { %648 = vmatprep.subr.bf16.mxu0 %v647_v54  ;;  %v36_v14 = vld [vmem:[%s1144_s1 + $0x68] sm:$0xff]  ;;  %v83_v15 = vld [vmem:[%s1144_s1 + $0x1e0] sm:$0xff]  ;;  %v53_v18 = vld [vmem:[%s1144_s1 + $0xf0] sm:$0xff]  ;;  %v685_v22 = vpack.c.bf16 %v66_v9, %v65_v7 }
  0x13   :  { %678 = vmatpush3.bf16.msra.mxu1 %v677_v57  ;;  %v84_v17 = vld [vmem:[%s1144_s1 + $0x1e8] sm:$0xff]  ;;  %v54_v19 = vld [vmem:[%s1144_s1 + $0xf8] sm:$0xff]  ;;  %v67_v26 = vld [vmem:[%s1144_s1 + $0x160] sm:$0xff]  ;;  %v657_v29 = vpack.c.bf16 %v36_v14, %v35_v13  ;;  %v776_v14 = vmov 0.0  }
  0x14   :  { %680 = vmatprep.subr.bf16.mxu1 %v679_v60  ;;  %v737_v23 = vld [vmem:[%s1143_s0] ss:$14 sps:$4 sm:$0xff]   ;;  %v739_v24 = vld [vmem:[%s1143_s0 + $0x1c] ss:$14 sps:$4 sm:$0xff]   ;;  %v687_v25 = vpack.c.bf16 %v84_v17, %v83_v15  ;;  %v741_v33 = vld [vmem:[%s1143_s0 + $0x4] ss:$14 sps:$4 sm:$0xff]   ;;  %v659_v35 = vpack.c.bf16 %v54_v19, %v53_v18 }
  0x15   :  { %650 = vmatpush3.bf16.msra.mxu0 %v649_v63  ;;  %v68_v27 = vld [vmem:[%s1144_s1 + $0x168] sm:$0xff]  ;;  %v85_v28 = vld [vmem:[%s1144_s1 + $0x1f0] sm:$0xff]  ;;  %v86_v30 = vld [vmem:[%s1144_s1 + $0x1f8] sm:$0xff]  ;;  %v146_v31 = vrot.slane %v737_v23, %v968_v20  ;;  %v160_v32 = vrot.slane %v739_v24, %v968_v20  ;;  %v153_v42 = vrot.slane %v741_v33, %v968_v20 }
  0x16   :  { %652 = vmatprep.subr.bf16.mxu0 %v651_v4  ;;  %v742_v34 = vld [vmem:[%s1143_s0 + $0x20] ss:$14 sps:$4 sm:$0xff]   ;;  %v38_v37 = vld [vmem:[%s1144_s1 + $0x78] sm:$0xff]  ;;  %v689_v38 = vpack.c.bf16 %v68_v27, %v67_v26  ;;  %v691_v44 = vpack.c.bf16 %v86_v30, %v85_v28  ;;  %v746_v5 = vld [vmem:[%s1143_s0 + $0x24] ss:$14 sps:$4 sm:$0xff]  }
  0x17   :  { %682 = vmatpush3.bf16.msra.mxu1 %v681_v8  ;;  %v37_v36 = vld [vmem:[%s1144_s1 + $0x70] sm:$0xff]  ;;  %v169_v39 = vcombine.high %v146_v31, %v160_v32  ;;  %v103_v40 = vld [vmem:[%s1144_s1 + $0x280] sm:$0xff]  ;;  %v104_v41 = vld [vmem:[%s1144_s1 + $0x288] sm:$0xff]  ;;  %v167_v43 = vrot.slane %v742_v34, %v968_v20  ;;  %v168_v55 = vcombine.low %v146_v31, %v160_v32  ;;  %v196_v11 = vrot.slane %v746_v5, %v968_v20 }
  0x18   :  { %684 = vmatprep.subr.bf16.mxu1 %v683_v12  ;;  %v69_v45 = vld [vmem:[%s1144_s1 + $0x170] sm:$0xff]  ;;  %v70_v46 = vld [vmem:[%s1144_s1 + $0x178] sm:$0xff]  ;;  %v661_v47 = vpack.c.bf16 %v38_v37, %v37_v36  ;;  %v695_v49 = vpack.c.bf16 %v104_v41, %v103_v40  ;;  %v87_v50 = vld [vmem:[%s1144_s1 + $0x200] sm:$0xff] }
  0x19   :  { %654 = vmatpush3.bf16.msra.mxu0 %v653_v16  ;;  %280 = vmatprep.mubr.f32.mxu0 %v169_v39  ;;  %v171_v48 = vcombine.high %v153_v42, %v167_v43  ;;  %v88_v51 = vld [vmem:[%s1144_s1 + $0x208] sm:$0xff]  ;;  %v693_v52 = vpack.c.bf16 %v70_v46, %v69_v45  ;;  %v105_v53 = vld [vmem:[%s1144_s1 + $0x290] sm:$0xff]  ;;  %v106_v54 = vld [vmem:[%s1144_s1 + $0x298] sm:$0xff]  ;;  %v170_v57 = vcombine.low %v153_v42, %v167_v43 }
  0x1a   :  { %656 = vmatprep.subr.bf16.mxu0 %v655_v21  ;;  %v697_v56 = vpack.c.bf16 %v88_v51, %v87_v50  ;;  %v699_v58 = vpack.c.bf16 %v106_v54, %v105_v53  ;;  %v89_v59 = vld [vmem:[%s1144_s1 + $0x210] sm:$0xff]  ;;  %v90_v60 = vld [vmem:[%s1144_s1 + $0x218] sm:$0xff]  ;;  %v107_v61 = vld [vmem:[%s1144_s1 + $0x2a0] sm:$0xff] }
  0x1b   :  { %686 = vmatpush3.bf16.msra.mxu1 %v685_v22  ;;  %350 = vmatprep.mubr.f32.mxu1 %v171_v48  ;;  %v108_v62 = vld [vmem:[%s1144_s1 + $0x2a8] sm:$0xff]  ;;  %v91_v63 = vld [vmem:[%s1144_s1 + $0x220] sm:$0xff]  ;;  %v701_v2 = vpack.c.bf16 %v90_v60, %v89_v59  ;;  %v109_v3 = vld [vmem:[%s1144_s1 + $0x2b0] sm:$0xff] }
  0x1c   :  { %688 = vmatprep.subr.bf16.mxu1 %v687_v25  ;;  %v92_v0 = vld [vmem:[%s1144_s1 + $0x228] sm:$0xff]  ;;  %v703_v6 = vpack.c.bf16 %v108_v62, %v107_v61  ;;  %v110_v9 = vld [vmem:[%s1144_s1 + $0x2b8] sm:$0xff]  ;;  %v119_v12 = vld [vmem:[%s1144_s1 + $0x300] sm:$0xff] }
  0x1d   :  { %658 = vmatpush3.bf16.msra.mxu0 %v657_v29  ;;  %v743_v4 = vld [vmem:[%s1143_s0 + $0x8] ss:$14 sps:$4 sm:$0xff]   ;;  %v745_v7 = vld [vmem:[%s1143_s0 + $0xc] ss:$14 sps:$4 sm:$0x33]   ;;  %v705_v18 = vpack.c.bf16 %v92_v0, %v91_v63  ;;  %v707_v21 = vpack.c.bf16 %v110_v9, %v109_v3  ;;  %v95_v28 = vld [vmem:[%s1144_s1 + $0x240] sm:$0xff] }
  0x1e   :  { %660 = vmatprep.subr.bf16.mxu0 %v659_v35  ;;  %v748_v8 = vld [vmem:[%s1143_s0 + $0x28] ss:$14 sps:$4 sm:$0x33]   ;;  %v182_v10 = vrot.slane %v743_v4, %v968_v20  ;;  %v189_v15 = vrot.slane %v745_v7, %v968_v20  ;;  %v94_v23 = vld [vmem:[%s1144_s1 + $0x238] sm:$0xff]  ;;  %v115_v36 = vld [vmem:[%s1144_s1 + $0x2e0] sm:$0xff] }
  0x1f   :  { %690 = vmatpush3.bf16.msra.mxu1 %v689_v38  ;;  %v120_v13 = vld [vmem:[%s1144_s1 + $0x308] sm:$0xff]  ;;  %v203_v16 = vrot.slane %v748_v8, %v968_v20  ;;  %v93_v22 = vld [vmem:[%s1144_s1 + $0x230] sm:$0xff]  ;;  %v111_v20 = vld [vmem:[%s1144_s1 + $0x2c0] sm:$0xff] }
  0x20   :  { %692 = vmatprep.subr.bf16.mxu1 %v691_v44  ;;  %v728_v17 = vpack.c.bf16 %v120_v13, %v119_v12  ;;  %v205_v19 = vcombine.high %v182_v10, %v196_v11  ;;  %v112_v25 = vld [vmem:[%s1144_s1 + $0x2c8] sm:$0xff]  ;;  %v709_v26 = vpack.c.bf16 %v94_v23, %v93_v22  ;;  %v113_v30 = vld [vmem:[%s1144_s1 + $0x2d0] sm:$0xff]  ;;  %v114_v31 = vld [vmem:[%s1144_s1 + $0x2d8] sm:$0xff] }
  0x21   :  { %662 = vmatpush3.bf16.msra.mxu0 %v661_v47  ;;  %v206_v24 = vcombine.low %v189_v15, %v203_v16  ;;  %v711_v27 = vpack.c.bf16 %v112_v25, %v111_v20  ;;  %v96_v29 = vld [vmem:[%s1144_s1 + $0x248] sm:$0xff]  ;;  %v715_v33 = vpack.c.bf16 %v114_v31, %v113_v30  ;;  %v97_v34 = vld [vmem:[%s1144_s1 + $0x250] sm:$0xff]  ;;  %v98_v35 = vld [vmem:[%s1144_s1 + $0x258] sm:$0xff] }
  0x22   :  { %696 = vmatprep.subr.bf16.mxu0 %v695_v49  ;;  %v713_v32 = vpack.c.bf16 %v96_v29, %v95_v28  ;;  %v116_v37 = vld [vmem:[%s1144_s1 + $0x2e8] sm:$0xff]  ;;  %v717_v38 = vpack.c.bf16 %v98_v35, %v97_v34  ;;  %v99_v40 = vld [vmem:[%s1144_s1 + $0x260] sm:$0xff]  ;;  %v117_v42 = vld [vmem:[%s1144_s1 + $0x2f0] sm:$0xff]  ;;  %v204_v49 = vcombine.low %v182_v10, %v196_v11 }
  0x23   :  { %694 = vmatpush3.bf16.msra.mxu1 %v693_v52  ;;  %v719_v39 = vpack.c.bf16 %v116_v37, %v115_v36  ;;  %v100_v41 = vld [vmem:[%s1144_s1 + $0x268] sm:$0xff]  ;;  %v118_v43 = vld [vmem:[%s1144_s1 + $0x2f8] sm:$0xff]  ;;  %v101_v46 = vld [vmem:[%s1144_s1 + $0x270] sm:$0xff] }
  0x24   :  { %281 = vmatmul.mubr.f32.vlgmr.msra.gmra.mrb[0].mxu0 %v168_v55  ;;  %727 = vmatprep.subr.bf16.mxu1 %v774_v1  ;;  %v721_v44 = vpack.c.bf16 %v100_v41, %v99_v40  ;;  %v723_v45 = vpack.c.bf16 %v118_v43, %v117_v42  ;;  %v102_v47 = vld [vmem:[%s1144_s1 + $0x278] sm:$0xff]  ;;  %v514_v51 = vld [vmem:[%s1145_s2] ss:$0 sm:$0xff] }
  0x25   :  { %698 = vmatpush3.bf16.msra.mxu0 %v697_v56  ;;  %420 = vmatprep.mubr.f32.mxu0 %v205_v19  ;;  %v725_v48 = vpack.c.bf16 %v102_v47, %v101_v46 }
  0x26   :  { %351 = vmatmul.mubr.f32.vlgmr.msra.gmra.mrb[0].mxu1 %v170_v57  ;;  %700 = vmatprep.subr.bf16.mxu0 %v699_v58 }
  0x27   :  { %628 = vmatprep.mubr.msk.f32.mxu1 %vm775_vm0, %v776_v14  ;;  %729 = vmatpush3.bf16.msra.mxu1 %v728_v17 }
  0x29   :  { %702 = vmatpush3.bf16.msra.mxu0 %v701_v2 }
  0x2a   :  { %704 = vmatprep.subr.bf16.mxu0 %v703_v6  ;;  %629 = vmatmul.mubr.msk.f32.vlgmr.msra.gmra.mrb[2].mxu1 %vm213_vm1, %v206_v24 }
  0x2d   :  { %706 = vmatpush3.bf16.msra.mxu0 %v705_v18 }
  0x2e   :  { %708 = vmatprep.subr.bf16.mxu0 %v707_v21 }
  0x31   :  { %710 = vmatpush3.bf16.msra.mxu0 %v709_v26 }
  0x32   :  { %712 = vmatprep.subr.bf16.mxu0 %v711_v27 }
  0x35   :  { %714 = vmatpush3.bf16.msra.mxu0 %v713_v32 }
  0x36   :  { %716 = vmatprep.subr.bf16.mxu0 %v715_v33 }
  0x39   :  { %718 = vmatpush3.bf16.msra.mxu0 %v717_v38 }
  0x3a   :  { %720 = vmatprep.subr.bf16.mxu0 %v719_v39 }
  0x3d   :  { %722 = vmatpush3.bf16.msra.mxu0 %v721_v44 }
  0x3e   :  { %724 = vmatprep.subr.bf16.mxu0 %v723_v45 }
  0x41   :  { %726 = vmatpush3.bf16.msra.mxu0 %v725_v48 }
  0x44   :  { %421 = vmatmul.mubr.f32.vlgmr.msra.gmra.mrb[2].mxu0 %v204_v49 }
  0xf7   :  { %v548_v50 = vpop.f32.mrb[0].mxu0 }
  0xf8   :  { %v549_v52 = vpop.f32.mrb[1].mxu0 }
  0xf9   :  { %v550_v53 = vadd.f32 %v549_v52, %v548_v50  ;;  %v583_v54 = vpop.f32.mrb[0].mxu1 }
  0xfa   :  { %v584_v55 = vpop.f32.mrb[1].mxu1 }
  0xfb   :  { %v283_v56 = vadd.f32 %v550_v53, %v514_v51  ;;  %v585_v57 = vadd.f32 %v584_v55, %v583_v54 }
  0xfd   :  { %v353_v58 = vadd.f32 %v585_v57, %v283_v56  ;;  %v492_v59 = vpop.f32.mrb[2].mxu1 }
  0xfe   :  { %v630_v60 = vpop.f32.mrb[3].mxu1 }
 0x117   :  { %v618_v61 = vpop.f32.mrb[2].mxu0 }
 0x118   :  { %v619_v62 = vpop.f32.mrb[3].mxu0 }
 0x119   :  { %v620_v63 = vadd.f32 %v619_v62, %v618_v61 }
 0x11b   :  { %v423_v0 = vadd.f32 %v620_v63, %v353_v58 }
 0x11d   :  { %v493_v1 = vadd.f32 %v492_v59, %v423_v0 }
 0x11f   :  { %497 = vst.msk [vmem:[#allocation2] sm:$0xff] %vm496_vm2, %v493_v1 }
 0x120   :  { %502 = vsyncadd [#allocation3], 96  ;;  %s777_s1 = smov [#allocation2]  }
 0x121   :  { %s503_s8 = sshll.u32 %s777_s1, 4  ;;  %s504_s8 = int_to_ptr.vmem [resolvable:$true] %s503_s8 }
 0x122   :  { %s749_s2 = scalar_lea.vmem %s504_s8, 32  ;;  %s753_s9 = scalar_lea.vmem %s504_s8, 128 }
 0x123   :  { %p750_p0 = scmp.ne.s32.totalorder %s504_s8, %s749_s2  ;;  %p754_p1 = scmp.lt.s32.totalorder %s504_s8, %s504_s8 }
 0x124   :  { %p755_p2 = scmp.lt.s32.totalorder %s753_s9, %s749_s2 }
 0x126   :  { %p756_p3 = por %p755_p2, %p754_p1 }
 0x128   :  { %p757_p4 = pnand %p756_p3, %p750_p0 }
 0x12a   :  { %760 = shalt.err (!%p757_p4)
}
 0x12b   :  { %s761_s12 = scalar_lea.hbm %s1146_s3, 32 }
 0x12c   :  { %p762_p5 = scmp.ne.s32.totalorder %s1146_s3, %s761_s12  ;;  %p765_p6 = scmp.lt.u32.totalorder %s761_s12, %s1146_s3 }
 0x12e   :  { %p767_p7 = pnand %p765_p6, %p762_p5 }
 0x130   :  { %770 = shalt.err (!%p767_p7)
}
 0x131   :  { %s778_s17 = smov 32   ;;  %s779_s18 = smov 2  }
 0x132   :  { %509 = dma.vmem_to_hbm [thread:$0]  %s504_s8, 32, %s1146_s3, [#allocation3], %s778_s17, %s778_s17, %s779_s18  }
 0x133   :  { %771 = dma.done.wait [#allocation3], 128  }
 0x134   :  { %772 = vsyncadd [#allocation3], 4294967168 }
 0x135   :  { %513 = vsyncpa [#allocation3], 1 }

</bundles_post_ra>
